<compile_context>
chip_gen: v7x
topology: tpu7x:2x2x1
jax: 0.10.0
libtpu: 0.0.40
codegen_flags: <defaults>
</compile_context>

<pallas_src>
import functools

import jax
import jax.numpy as jnp
from jax.experimental import pallas as pl
from jax.experimental.pallas import tpu as pltpu


_LANE = 128
_JNP_MAX_ELEMS = 4096           # <= this many elements: fused pure-jnp path (no pallas_call)
_SINGLE_BLOCK_MAX_ROWS = 1024   # (1024, 128) f32 block = 512 KiB: one VMEM block, no grid
_ROW_TILE = 4096                # gridded path: 2 MiB blocks, ~8 MiB double-buffered in+out


def _round_up(v, m):
    return ((v + m - 1) // m) * m


# ---------------------------------------------------------------------------
# Quantization parameter containers (plain Python, mirrors the PyTorch classes)
# ---------------------------------------------------------------------------
class QuantizationParams:
    def __init__(self, q_type):
        self.q_type = q_type


class SignedFixedQuantizationParams(QuantizationParams):
    def __init__(self, bit_width, int_bit_width, q_type):
        super().__init__(q_type)
        self.bit_width = bit_width
        self.int_bit_width = int_bit_width
        self.frac_bit_width = self.bit_width - self.int_bit_width
        self.prescale = 2 ** self.frac_bit_width
        self.postscale = 2 ** (-self.frac_bit_width)
        self.min_val = -2 ** (self.int_bit_width - 1)
        self.max_val = -self.min_val - self.postscale


class UnsignedFixedQuantizationParams(QuantizationParams):
    def __init__(self, bit_width, int_bit_width, q_type):
        super().__init__(q_type)
        self.bit_width = bit_width
        self.int_bit_width = int_bit_width
        self.frac_bit_width = self.bit_width - self.int_bit_width
        self.prescale = 2 ** self.frac_bit_width
        self.postscale = 2 ** (-self.frac_bit_width)
        self.min_val = 0.0
        self.max_val = 2 ** self.int_bit_width - self.postscale


# ---------------------------------------------------------------------------
# Shared quantize math: trunc / abs-compare / round / select / scale / clip.
# Exactly the same chain is used by the jnp fast path and the Pallas kernel.
# ---------------------------------------------------------------------------
def _quantize_math(x_f32, prescale, postscale, min_val, max_val):
    q = x_f32 * prescale
    t = jnp.trunc(q)                       # == torch `q.int()` truncation for |q| < 2^31
    frac = q - t
    # round-to-nearest; exact .5 ties toward zero:
    #   frac == +0.5 -> floor(q) == trunc(q),  frac == -0.5 -> ceil(q) == trunc(q)
    r = jnp.where(jnp.abs(frac) == 0.5, t, jnp.round(q))
    return jnp.clip(r * postscale, min_val, max_val)


# ---------------------------------------------------------------------------
# Pallas kernel: elementwise fixed-point quantize on a lane-dense 2-D tile
# ---------------------------------------------------------------------------
def _quantize_kernel(x_ref, o_ref, *, prescale, postscale, min_val, max_val):
    y = _quantize_math(x_ref[...].astype(jnp.float32),
                       prescale, postscale, min_val, max_val)
    o_ref[...] = y.astype(o_ref.dtype)


def _pallas_quantize_aligned(x2d, dtype, kparams, *, single_block_max_rows, row_tile):
    """Quantize a lane-dense (rows, 128) array with the Pallas kernel."""
    rows, cols = x2d.shape
    kernel = functools.partial(_quantize_kernel, **kparams)

    if rows <= single_block_max_rows:
        # Small/medium path: one full-extent VMEM block, no grid machinery.
        return pl.pallas_call(
            kernel,
            out_shape=jax.ShapeDtypeStruct((rows, cols), dtype),
        )(x2d)

    # Gridded path: large lane-dense blocks on a parallel 1-D grid.
    # Tile chosen so the grid always has >= 2 blocks (shards across v7x's
    # two TensorCores) and caps at _ROW_TILE (2 MiB blocks).
    tile = min(row_tile, _round_up((rows + 1) // 2, 8))
    return pl.pallas_call(
        kernel,
        out_shape=jax.ShapeDtypeStruct((rows, cols), dtype),
        grid=(pl.cdiv(rows, tile),),
        in_specs=[pl.BlockSpec((tile, cols), lambda i: (i, 0))],
        out_specs=pl.BlockSpec((tile, cols), lambda i: (i, 0)),
        compiler_params=pltpu.CompilerParams(
            dimension_semantics=("parallel",),
            vmem_limit_bytes=32 << 20),
    )(x2d)


def _pallas_quantize(x, params, *,
                     jnp_max_elems=_JNP_MAX_ELEMS,
                     single_block_max_rows=_SINGLE_BLOCK_MAX_ROWS,
                     row_tile=_ROW_TILE):
    """Quantize an arbitrarily shaped array (dispatch: jnp / single-block / grid)."""
    orig_shape = x.shape
    dtype = x.dtype
    n = x.size
    if n == 0:
        return x

    pre = float(params.prescale)
    post = float(params.postscale)
    lo = float(params.min_val)
    hi = float(params.max_val)

    # Tiny inputs (the advertised bias case): fused XLA elementwise chain,
    # no pallas_call launch latency.
    if n <= jnp_max_elems:
        return _quantize_math(x.astype(jnp.float32), pre, post, lo, hi).astype(dtype)

    kparams = dict(prescale=pre, postscale=post, min_val=lo, max_val=hi)
    flat = x.reshape(-1)
    tail_n = n % _LANE
    aligned = n - tail_n

    if aligned == 0:
        # Only reachable with overridden thresholds (n < 128): plain jnp.
        return _quantize_math(x.astype(jnp.float32), pre, post, lo, hi).astype(dtype)

    prefix = flat if tail_n == 0 else flat[:aligned]
    out_prefix = _pallas_quantize_aligned(
        prefix.reshape(aligned // _LANE, _LANE), dtype, kparams,
        single_block_max_rows=single_block_max_rows, row_tile=row_tile)

    if tail_n == 0:
        return out_prefix.reshape(orig_shape)

    # Large ragged input: <128-element tail handled with the same jnp chain
    # (no whole-array pad / slice passes).
    tail = _quantize_math(flat[aligned:].astype(jnp.float32),
                          pre, post, lo, hi).astype(dtype)
    out = jnp.concatenate([out_prefix.reshape(-1), tail])
    return out.reshape(orig_shape)


# ---------------------------------------------------------------------------
# BiasQuantizationScheme (JAX/Pallas version) — forward pass only.
# ---------------------------------------------------------------------------
class BiasQuantizationScheme:
    def __init__(self, q_type, threshold=None, bit_width=None, int_bit_width=None):
        if q_type == 'identity':
            self.q_params = QuantizationParams(q_type)
        elif q_type == 'fixed_unsigned':
            self.q_params = UnsignedFixedQuantizationParams(bit_width, int_bit_width, q_type)
        elif q_type == 'fixed_signed':
            self.q_params = SignedFixedQuantizationParams(bit_width, int_bit_width, q_type)
        else:
            raise Exception('Unknown quantization scheme: {}.'.format(q_type))

    def __call__(self, x):
        if self.q_params.q_type == 'identity':
            return x                        # straight passthrough (Identity.forward)
        return _pallas_quantize(x, self.q_params)
        # TODO(synk): the straight-through-estimator backward (QuantizeFixedWeight.backward)
        # is not represented; this implements the forward pass only (needs jax.custom_vjp).


# ---------------------------------------------------------------------------
# Pure-JAX reference — literal translation of the torch quantize() chain
# ---------------------------------------------------------------------------
def _reference_quantize(x, params):
    q = x.astype(jnp.float32) * params.prescale
    r = jnp.round(q)
    f = jnp.floor(q)
    c = jnp.ceil(q)
    frac = q - q.astype(jnp.int32).astype(jnp.float32)   # torch `q - q.int()`
    t = jnp.where(frac == 0.5, f, r)
    t = jnp.where(frac == -0.5, c, t)
    out = jnp.clip(t * params.postscale, params.min_val, params.max_val)
    return out.astype(x.dtype)


if __name__ == "__main__":
    key = jax.random.PRNGKey(0)
    k1, k2, k3, k4 = jax.random.split(key, 4)

    signed = BiasQuantizationScheme('fixed_signed', bit_width=8, int_bit_width=3)
    unsigned = BiasQuantizationScheme('fixed_unsigned', bit_width=8, int_bit_width=2)

    # 1) Typical bias vector (64 channels, f32) -> jnp fast path.
    #    Exact .5 ties in the prescaled domain (prescale = 2**5 = 32) exercise
    #    round-half-toward-zero (differs from plain round-half-to-even at 1.5).
    bias = jax.random.normal(k1, (64,), dtype=jnp.float32) * 3.0
    bias = bias.at[0].set(1.5 / 32.0).at[1].set(-1.5 / 32.0)
    bias = bias.at[2].set(0.5 / 32.0).at[3].set(-2.5 / 32.0)
    out_s = jax.block_until_ready(signed(bias))
    ref_s = _reference_quantize(bias, signed.q_params)
    assert out_s.dtype == bias.dtype and out_s.shape == bias.shape
    assert jnp.array_equal(out_s, ref_s), "fixed_signed mismatch vs reference"
    # tie semantics: 1.5/32 -> 1/32 (toward zero), not 2/32 (half-to-even)
    assert bool(out_s[0] == 1.0 / 32.0) and bool(out_s[1] == -1.0 / 32.0)

    # 2) Ragged small unsigned bias -> jnp fast path.
    bias_u = jnp.abs(jax.random.normal(k2, (37,), dtype=jnp.float32)) * 2.0
    out_u = jax.block_until_ready(unsigned(bias_u))
    ref_u = _reference_quantize(bias_u, unsigned.q_params)
    assert jnp.array_equal(out_u, ref_u), "fixed_unsigned mismatch vs reference"

    # 3) Medium input (40x128 = 5120 elems > jnp threshold) -> single-block Pallas path.
    x_mid = jax.random.normal(k3, (40, 128), dtype=jnp.float32) * 4.0
    out_m = jax.block_until_ready(signed(x_mid))
    ref_m = _reference_quantize(x_mid, signed.q_params)
    assert jnp.array_equal(out_m, ref_m), "single-block Pallas path mismatch vs reference"

    # 4) Gridded Pallas path (reduced thresholds), including a partial boundary
    #    block (40 rows with a 16-row tile -> grid of 3, last block masked).
    out_g = jax.block_until_ready(
        _pallas_quantize(x_mid, signed.q_params,
                         jnp_max_elems=0, single_block_max_rows=8, row_tile=16))
    assert jnp.array_equal(out_g, ref_m), "gridded path mismatch vs reference"

    # 5) Large-ragged dispatch (reduced thresholds): 128-aligned prefix through
    #    the gridded kernel, <128-element tail through jnp.
    x_rag = jax.random.normal(k4, (5000,), dtype=jnp.float32) * 4.0
    out_r = jax.block_until_ready(
        _pallas_quantize(x_rag, signed.q_params,
                         jnp_max_elems=0, single_block_max_rows=8, row_tile=16))
    ref_r = _reference_quantize(x_rag, signed.q_params)
    assert jnp.array_equal(out_r, ref_r), "ragged prefix+tail path mismatch vs reference"

    # 6) Identity scheme passthrough sanity check.
    ident = BiasQuantizationScheme('identity')
    assert jnp.array_equal(ident(bias), bias)

    print("KERNEL_OK")
</pallas_src>

<mosaic_0001>
module attributes {stable_mosaic.version = 11 : i64} {
  func.func @_quantize_kernel(%arg0: memref<40x128xf32, #tpu.memory_space<vmem>>, %arg1: memref<40x128xf32, #tpu.memory_space<vmem>>) attributes {dimension_semantics = [], scalar_prefetch = 0 : i64, scratch_operands = 0 : i64, tpu.core_type = #tpu.core_type<tc>} {
    %c0 = arith.constant 0 : index
    %c0_0 = arith.constant 0 : index
    %0 = vector.load %arg0[%c0, %c0_0] : memref<40x128xf32, #tpu.memory_space<vmem>>, vector<40x128xf32>
    %cst = arith.constant 3.200000e+01 : f32
    %1 = vector.broadcast %cst : f32 to vector<40x128xf32>
    %2 = arith.mulf %0, %1 : vector<40x128xf32>
    %cst_1 = arith.constant 0.000000e+00 : f32
    %3 = vector.broadcast %cst_1 : f32 to vector<40x128xf32>
    %4 = arith.cmpf olt, %2, %3 : vector<40x128xf32>
    %5 = math.ceil %2 : vector<40x128xf32>
    %6 = math.floor %2 : vector<40x128xf32>
    %7 = arith.select %4, %5, %6 : vector<40x128xi1>, vector<40x128xf32>
    %8 = arith.subf %2, %7 : vector<40x128xf32>
    %9 = math.absf %8 : vector<40x128xf32>
    %cst_2 = arith.constant 5.000000e-01 : f32
    %10 = vector.broadcast %cst_2 : f32 to vector<40x128xf32>
    %11 = arith.cmpf oeq, %9, %10 : vector<40x128xf32>
    %12 = math.roundeven %2 : vector<40x128xf32>
    %13 = arith.select %11, %7, %12 : vector<40x128xi1>, vector<40x128xf32>
    %cst_3 = arith.constant 3.125000e-02 : f32
    %14 = vector.broadcast %cst_3 : f32 to vector<40x128xf32>
    %15 = arith.mulf %13, %14 : vector<40x128xf32>
    %cst_4 = arith.constant -4.000000e+00 : f32
    %cst_5 = arith.constant 3.968750e+00 : f32
    %16 = vector.broadcast %cst_4 : f32 to vector<40x128xf32>
    %17 = arith.maximumf %16, %15 : vector<40x128xf32>
    %18 = vector.broadcast %cst_5 : f32 to vector<40x128xf32>
    %19 = arith.minimumf %18, %17 : vector<40x128xf32>
    %c0_6 = arith.constant 0 : index
    %c0_7 = arith.constant 0 : index
    %20 = vector.load %arg1[%c0_6, %c0_7] : memref<40x128xf32, #tpu.memory_space<vmem>>, vector<40x128xf32>
    tpu.vector_store %arg1[%c0_6, %c0_7], %19 {strides = array<i32>} : memref<40x128xf32, #tpu.memory_space<vmem>>, vector<40x128xf32>,
    return
  }
}

</mosaic_0001>

<bundles_post_ra>
// kernel: tpu_custom_call.1
= control target key start
LH: loop header
LB: loop body
LE: loop exit
PB: predicated region body
PF: predicated region fallthrough
CT: control target
= control target key end

     0   :  { %6 = vsyncpa [#allocation3], 0  ;;  %s216_s0 = inlined_call_operand.hbm [shape: f32[40,128], index: 0, kind: input, shape index: {}]   ;;  %s217_s1 = inlined_call_operand.hbm [shape: f32[40,128], index: 1, kind: output, shape index: {}]  }
   0x1   :  { %7 = vsyncpa [#allocation4], 0  ;;  %s172_s6 = smov [#allocation2]   ;;  %s124_s10 = scalar_lea.hbm %s216_s0, 640 }
   0x2   :  { %s13_s7 = sshll.u32 %s172_s6, 4  ;;  %p125_p0 = scmp.ne.s32.totalorder %s216_s0, %s124_s10  ;;  %s14_s7 = int_to_ptr.vmem [resolvable:$true] %s13_s7 }
   0x3   :  { %p128_p1 = scmp.lt.u32.totalorder %s124_s10, %s216_s0 }
   0x5   :  { %p130_p2 = pnand %p128_p1, %p125_p0 }
   0x7   :  { %133 = shalt.err (!%p130_p2)
}
   0x8   :  { %s134_s15 = scalar_lea.vmem %s14_s7, 640  ;;  %p139_p4 = scmp.lt.s32.totalorder %s14_s7, %s14_s7 }
   0x9   :  { %p135_p3 = scmp.ne.s32.totalorder %s14_s7, %s134_s15  ;;  %p140_p5 = scmp.lt.s32.totalorder %s134_s15, %s134_s15 }
   0xb   :  { %p141_p6 = por %p140_p5, %p139_p4 }
   0xd   :  { %p142_p7 = pnand %p141_p6, %p135_p3 }
   0xf   :  { %145 = shalt.err (!%p142_p7)
}
  0x10   :  { %s173_s16 = smov 128   ;;  %s174_s17 = smov 8  }
  0x11   :  { %19 = dma.hbm_to_vmem [thread:$0]  %s216_s0, 640, %s14_s7, [#allocation3], %s173_s16, %s173_s16, %s174_s17  }
  0x12   :  { %168 = dma.done.wait [#allocation3], 640  }
  0x13   :  { %169 = vsyncadd [#allocation3], 4294966656  ;;  %v23_v0 = vld [vmem:[#allocation2] sm:$0xff]  ;;  %v24_v1 = vld [vmem:[#allocation2 + $0x8] sm:$0xff]  ;;  %s175_s0 = smov [#allocation5]  }
  0x14   :  { %v25_v2 = vld [vmem:[#allocation2 + $0x10] sm:$0xff]  ;;  %v28_v3 = vmul.f32 32.0, %v23_v0  ;;  %v29_v4 = vmul.f32 32.0, %v24_v1  ;;  %v26_v6 = vld [vmem:[#allocation2 + $0x18] sm:$0xff]  ;;  %v27_v7 = vld [vmem:[#allocation2 + $0x20] sm:$0xff]  ;;  %s103_s20 = sshll.u32 %s175_s0, 4  ;;  %s104_s20 = int_to_ptr.vmem [resolvable:$true] %s103_s20 }
  0x15   :  { %v30_v5 = vmul.f32 32.0, %v25_v2  ;;  %v31_v8 = vmul.f32 32.0, %v26_v6  ;;  %v32_v11 = vmul.f32 32.0, %v27_v7  ;;  %s146_s21 = scalar_lea.vmem %s104_s20, 640  ;;  %p151_p9 = scmp.lt.s32.totalorder %s104_s20, %s104_s20 }
  0x16   :  { %vm33_vm0 = vcmp.lt.f32.partialorder %v28_v3, 0.0  ;;  %v38_v9 = vceil.f32 %v28_v3  ;;  %v43_v10 = vfloor.f32 %v28_v3  ;;  %v115_v12 = vround.rtne.f32 %v28_v3  ;;  %p147_p8 = scmp.ne.s32.totalorder %s104_s20, %s146_s21  ;;  %p152_p10 = scmp.lt.s32.totalorder %s146_s21, %s146_s21 }
  0x17   :  { %vm34_vm1 = vcmp.lt.f32.partialorder %v29_v4, 0.0  ;;  %v39_v13 = vceil.f32 %v29_v4  ;;  %v44_v14 = vfloor.f32 %v29_v4  ;;  %vm35_vm2 = vcmp.lt.f32.partialorder %v30_v5, 0.0 }
  0x18   :  { %v48_v15 = vsel %vm33_vm0, %v38_v9, %v43_v10  ;;  %v40_v16 = vceil.f32 %v30_v5  ;;  %v45_v17 = vfloor.f32 %v30_v5  ;;  %v116_v20 = vround.rtne.f32 %v29_v4  ;;  %p153_p11 = por %p152_p10, %p151_p9 }
  0x19   :  { %v53_v18 = vsub.f32 %v28_v3, %v48_v15  ;;  %v49_v19 = vsel %vm34_vm1, %v39_v13, %v44_v14  ;;  %vm36_vm3 = vcmp.lt.f32.partialorder %v31_v8, 0.0  ;;  %v41_v23 = vceil.f32 %v31_v8 }
  0x1a   :  { %v54_v21 = vsub.f32 %v29_v4, %v49_v19  ;;  %v50_v22 = vsel %vm35_vm2, %v40_v16, %v45_v17  ;;  %v46_v24 = vfloor.f32 %v31_v8  ;;  %v117_v27 = vround.rtne.f32 %v30_v5  ;;  %p154_p12 = pnand %p153_p11, %p147_p8 }
  0x1b   :  { %v58_v25 = vand.u32 2147483647, %v53_v18  ;;  %v55_v26 = vsub.f32 %v30_v5, %v50_v22  ;;  %vm37_vm4 = vcmp.lt.f32.partialorder %v32_v11, 0.0  ;;  %v42_v30 = vceil.f32 %v32_v11 }
  0x1c   :  { %v59_v28 = vand.u32 2147483647, %v54_v21  ;;  %v51_v29 = vsel %vm36_vm3, %v41_v23, %v46_v24  ;;  %v47_v31 = vfloor.f32 %v32_v11  ;;  %v118_v35 = vround.rtne.f32 %v31_v8 }
  0x1d   :  { %vm63_vm5 = vcmp.eq.f32.partialorder %v58_v25, 0.5  ;;  %v60_v32 = vand.u32 2147483647, %v55_v26  ;;  %v56_v33 = vsub.f32 %v31_v8, %v51_v29  ;;  %v119_v45 = vround.rtne.f32 %v32_v11 }
  0x1e   :  { %v73_v34 = vsel %vm63_vm5, %v48_v15, %v115_v12  ;;  %vm64_vm6 = vcmp.eq.f32.partialorder %v59_v28, 0.5  ;;  %v52_v36 = vsel %vm37_vm4, %v42_v30, %v47_v31 }
  0x1f   :  { %v78_v37 = vmul.f32 0.03125, %v73_v34  ;;  %v74_v38 = vsel %vm64_vm6, %v49_v19, %v116_v20  ;;  %vm65_vm7 = vcmp.eq.f32.partialorder %v60_v32, 0.5  ;;  %v61_v39 = vand.u32 2147483647, %v56_v33 }
  0x20   :  { %v79_v40 = vmul.f32 0.03125, %v74_v38  ;;  %v75_v41 = vsel %vm65_vm7, %v50_v22, %v117_v27  ;;  %v57_v42 = vsub.f32 %v32_v11, %v52_v36 }
  0x21   :  { %v83_v43 = vmax.f32 %v78_v37, -4.0  ;;  %v80_v44 = vmul.f32 0.03125, %v75_v41  ;;  %vm66_vm8 = vcmp.eq.f32.partialorder %v61_v39, 0.5 }
  0x22   :  { %v84_v46 = vmax.f32 %v79_v40, -4.0  ;;  %v76_v47 = vsel %vm66_vm8, %v51_v29, %v118_v35  ;;  %v62_v48 = vand.u32 2147483647, %v57_v42 }
  0x23   :  { %v88_v49 = vmin.f32 %v83_v43, 3.96875  ;;  %v85_v50 = vmax.f32 %v80_v44, -4.0  ;;  %v81_v51 = vmul.f32 0.03125, %v76_v47 }
  0x24   :  { %v89_v52 = vmin.f32 %v84_v46, 3.96875  ;;  %vm67_vm9 = vcmp.eq.f32.partialorder %v62_v48, 0.5 }
  0x25   :  { %93 = vst [vmem:[#allocation5] sm:$0xff] %v88_v49  ;;  %v90_v53 = vmin.f32 %v85_v50, 3.96875  ;;  %v86_v54 = vmax.f32 %v81_v51, -4.0  ;;  %v77_v55 = vsel %vm67_vm9, %v52_v36, %v119_v45 }
  0x26   :  { %94 = vst [vmem:[#allocation5 + $0x8] sm:$0xff] %v89_v52  ;;  %v82_v56 = vmul.f32 0.03125, %v77_v55 }
  0x27   :  { %95 = vst [vmem:[#allocation5 + $0x10] sm:$0xff] %v90_v53  ;;  %v91_v57 = vmin.f32 %v86_v54, 3.96875 }
  0x28   :  { %v87_v58 = vmax.f32 %v82_v56, -4.0 }
  0x29   :  { %96 = vst [vmem:[#allocation5 + $0x18] sm:$0xff] %v91_v57 }
  0x2a   :  { %v92_v59 = vmin.f32 %v87_v58, 3.96875 }
  0x2c   :  { %97 = vst [vmem:[#allocation5 + $0x20] sm:$0xff] %v92_v59 }
  0x2d   :  { %157 = shalt.err (!%p154_p12)
}
  0x2e   :  { %s158_s24 = scalar_lea.hbm %s217_s1, 640 }
  0x2f   :  { %p159_p13 = scmp.ne.s32.totalorder %s217_s1, %s158_s24  ;;  %p162_p0 = scmp.lt.u32.totalorder %s158_s24, %s217_s1 }
  0x31   :  { %p164_p1 = pnand %p162_p0, %p159_p13 }
  0x33   :  { %167 = shalt.err (!%p164_p1)
}
  0x34   :  { %109 = dma.vmem_to_hbm [thread:$0]  %s104_s20, 640, %s217_s1, [#allocation4], %s173_s16, %s173_s16, %s174_s17  }
  0x35   :  { %170 = dma.done.wait [#allocation4], 640  }
  0x36   :  { %171 = vsyncadd [#allocation4], 4294966656 }
  0x37   :  { %113 = vsyncpa [#allocation3], 1 }
  0x38   :  { %114 = vsyncpa [#allocation4], 1 }

</bundles_post_ra>
